<compile_context>
chip_gen: v7x
topology: tpu7x:2x2x1
jax: 0.10.0
libtpu: 0.0.40
codegen_flags: <defaults>
</compile_context>

<pallas_src>
import functools

import jax
import jax.numpy as jnp
from jax.experimental import pallas as pl
from jax.experimental.pallas import tpu as pltpu


def _pono_kernel(x_ref, gamma_ref, beta_ref, y_ref, mean_ref, std_ref, *, eps):
    # x_ref: (1, C, T) tile; gamma_ref/beta_ref: (1, 1, T) tile.
    x = x_ref[...].astype(jnp.float32)
    c = x.shape[1]

    mean = jnp.mean(x, axis=1, keepdims=True)                   # (1, 1, T)
    diff = x - mean                                             # (1, C, T)
    # torch Tensor.var defaults to unbiased=True -> divide by (C - 1).
    if c > 1:
        var = jnp.sum(diff * diff, axis=1, keepdims=True) * jnp.float32(1.0 / (c - 1))
    else:
        # torch: var of a single element with unbiased=True is NaN.
        var = jnp.full_like(mean, jnp.nan)
    veps = var + jnp.float32(eps)                               # (1, 1, T)

    std = jnp.sqrt(veps)                                        # small slab only
    inv_std = 1.0 / std                                         # small slab reciprocal (EUP)

    gamma = gamma_ref[...].astype(jnp.float32)                  # (1, 1, T)
    beta = beta_ref[...].astype(jnp.float32)                    # (1, 1, T)
    scale = inv_std * gamma                                     # fold gamma once
    y = diff * scale + beta                                     # (1, C, T)

    y_ref[...] = y.astype(y_ref.dtype)
    mean_ref[...] = mean.astype(mean_ref.dtype)
    std_ref[...] = std.astype(std_ref.dtype)


def _footprint_bytes(c, t, itemsize):
    """Estimated VMEM footprint for one spatial tile of width t."""
    big = 2 * 2 * c * t * itemsize          # x read + y write blocks, double-buffered
    small = 2 * 5 * t * itemsize            # gamma/beta/mean/std (1,1,t) blocks, double-buffered
    interm = 3 * c * t * 4                  # f32 temporaries (x, diff, y) in the body
    return big + small + interm


def _pick_spatial_tile(hw, c, itemsize, budget_bytes):
    """Pick the spatial tile width.

    Prefers the full HW row (single contiguous DMA per batch element); otherwise
    the largest 128-multiple that fits the budget (exact divisor of HW if one is
    close, else a pl.cdiv grid with a masked final block).
    """
    if hw <= 128:
        return hw  # block equals full dim -> always legal
    if _footprint_bytes(c, hw, itemsize) <= budget_bytes:
        return hw  # whole per-batch row fits: one big contiguous DMA per step
    per_lane = max(1, _footprint_bytes(c, 1, itemsize))
    t_max = max(128, (budget_bytes // per_lane) // 128 * 128)
    t_max = min(t_max, max(128, (hw // 128) * 128))
    if hw % 128 == 0:
        # Prefer an exact divisor (avoids a masked last block) if it is not much
        # smaller than t_max.
        best = 128
        d = 128
        while d <= t_max:
            if hw % d == 0:
                best = d
            d += 128
        if 2 * best >= t_max:
            return best
    return t_max


def pono(x, gamma, beta, eps=1e-5):
    """x: (N, C, H, W); gamma/beta: (1, 1, H, W). Returns (y, mean, std)."""
    n, c, h, w = x.shape
    hw = h * w
    itemsize = jnp.dtype(x.dtype).itemsize

    # Flatten spatial dims so the lane axis is dense.
    x_f = x.reshape(n, c, hw)
    gamma_f = gamma.reshape(1, 1, hw)
    beta_f = beta.reshape(1, 1, hw)

    # Generation-aware VMEM budget (v5e/v6e: 128 MiB, v7x: 64 MiB per TC).
    try:
        vmem_cap = int(pltpu.get_tpu_info().vmem_capacity_bytes)
    except Exception:
        vmem_cap = 64 * 1024 * 1024  # conservative fallback (v7x per-TC)
    vmem_limit = min(vmem_cap - 4 * 1024 * 1024, (vmem_cap * 3) // 4)
    tile_budget = vmem_limit // 2  # headroom for compiler-internal scratch

    tile = _pick_spatial_tile(hw, c, itemsize, tile_budget)
    n_tiles = pl.cdiv(hw, tile)

    kernel = functools.partial(_pono_kernel, eps=eps)

    # Batch axis innermost: gamma/beta block index is constant across it, so the
    # pipeline does not re-fetch the parameters every step.
    grid_spec = pltpu.PrefetchScalarGridSpec(
        num_scalar_prefetch=0,
        grid=(n_tiles, n),
        in_specs=[
            pl.BlockSpec((1, c, tile), lambda j, i: (i, 0, j)),   # x
            pl.BlockSpec((1, 1, tile), lambda j, i: (0, 0, j)),   # gamma (reused over i)
            pl.BlockSpec((1, 1, tile), lambda j, i: (0, 0, j)),   # beta  (reused over i)
        ],
        out_specs=[
            pl.BlockSpec((1, c, tile), lambda j, i: (i, 0, j)),   # y
            pl.BlockSpec((1, 1, tile), lambda j, i: (i, 0, j)),   # mean
            pl.BlockSpec((1, 1, tile), lambda j, i: (i, 0, j)),   # std
        ],
    )

    out_shapes = (
        jax.ShapeDtypeStruct((n, c, hw), x.dtype),
        jax.ShapeDtypeStruct((n, 1, hw), x.dtype),
        jax.ShapeDtypeStruct((n, 1, hw), x.dtype),
    )

    # Advisory cost for XLA scheduling: this op is HBM-bandwidth bound.
    flops = 7 * n * c * hw
    transcendentals = 2 * n * hw
    bytes_accessed = (
        2 * n * c * hw      # x read + y write
        + 2 * n * hw        # mean + std writes
        + 2 * hw            # gamma + beta (fetched once per spatial tile)
    ) * itemsize
    cost = pl.CostEstimate(
        flops=flops, transcendentals=transcendentals, bytes_accessed=bytes_accessed
    )

    y_f, mean_f, std_f = pl.pallas_call(
        kernel,
        out_shape=out_shapes,
        grid_spec=grid_spec,
        compiler_params=pltpu.CompilerParams(
            dimension_semantics=("parallel", "parallel"),
            vmem_limit_bytes=int(vmem_limit),
        ),
        cost_estimate=cost,
    )(x_f, gamma_f, beta_f)

    return (
        y_f.reshape(n, c, h, w),
        mean_f.reshape(n, 1, h, w),
        std_f.reshape(n, 1, h, w),
    )


def _pono_ref(x, gamma, beta, eps=1e-5):
    mean = jnp.mean(x, axis=1, keepdims=True)
    var = jnp.var(x, axis=1, keepdims=True, ddof=1)   # unbiased, like torch default
    std = jnp.sqrt(var + eps)
    y = (x - mean) / std * gamma + beta
    return y, mean, std


if __name__ == "__main__":
    # Module __init__: PONO(input_size=(H, W), affine=True) -> gamma/beta of (1,1,H,W)
    N, C, H, W = 2, 4, 16, 16
    key = jax.random.PRNGKey(0)
    x = jax.random.normal(key, (N, C, H, W), dtype=jnp.float32)

    # Deterministic parameter init (matches nn.Parameter init: beta=zeros, gamma=ones).
    gamma = jnp.ones((1, 1, H, W), dtype=jnp.float32)
    beta = jnp.zeros((1, 1, H, W), dtype=jnp.float32)

    y, mean, std = pono(x, gamma, beta)
    jax.block_until_ready((y, mean, std))

    y_ref, mean_ref, std_ref = _pono_ref(x, gamma, beta)
    assert jnp.allclose(y, y_ref, atol=1e-5, rtol=1e-5)
    assert jnp.allclose(mean, mean_ref, atol=1e-6, rtol=1e-6)
    assert jnp.allclose(std, std_ref, atol=1e-6, rtol=1e-6)

    print("KERNEL_OK")
</pallas_src>

<mosaic_0001>
module attributes {stable_mosaic.version = 11 : i64} {
  func.func @_pono_kernel(%arg0: i32, %arg1: i32, %arg2: memref<1x4x256xf32, #tpu.memory_space<vmem>>, %arg3: memref<1x1x256xf32, #tpu.memory_space<vmem>>, %arg4: memref<1x1x256xf32, #tpu.memory_space<vmem>>, %arg5: memref<1x4x256xf32, #tpu.memory_space<vmem>>, %arg6: memref<1x1x256xf32, #tpu.memory_space<vmem>>, %arg7: memref<1x1x256xf32, #tpu.memory_space<vmem>>) attributes {dimension_semantics = [#tpu.dimension_semantics<parallel>, #tpu.dimension_semantics<parallel>], iteration_bounds = array<i64: 1, 2>, scalar_prefetch = 0 : i64, scratch_operands = 0 : i64, tpu.core_type = #tpu.core_type<tc>, window_params = [{transform_indices = @transform_0, window_bounds = array<i64: 1, 4, 256>}, {transform_indices = @transform_1, window_bounds = array<i64: 1, 1, 256>}, {transform_indices = @transform_2, window_bounds = array<i64: 1, 1, 256>}, {transform_indices = @transform_3, window_bounds = array<i64: 1, 4, 256>}, {transform_indices = @transform_4, window_bounds = array<i64: 1, 1, 256>}, {transform_indices = @transform_5, window_bounds = array<i64: 1, 1, 256>}]} {
    %c0 = arith.constant 0 : index
    %c0_0 = arith.constant 0 : index
    %c0_1 = arith.constant 0 : index
    %0 = vector.load %arg2[%c0, %c0_0, %c0_1] : memref<1x4x256xf32, #tpu.memory_space<vmem>>, vector<1x4x256xf32>
    %cst = arith.constant dense<0.000000e+00> : vector<1x256xf32>
    %1 = vector.multi_reduction <add>, %0, %cst [1] : vector<1x4x256xf32> to vector<1x256xf32>
    %2 = vector.shape_cast %1 : vector<1x256xf32> to vector<1x1x256xf32>
    %cst_2 = arith.constant 4.000000e+00 : f32
    %3 = vector.broadcast %cst_2 : f32 to vector<1x1x256xf32>
    %4 = arith.divf %2, %3 : vector<1x1x256xf32>
    %5 = vector.broadcast %4 : vector<1x1x256xf32> to vector<1x4x256xf32>
    %6 = arith.subf %0, %5 : vector<1x4x256xf32>
    %7 = arith.mulf %6, %6 : vector<1x4x256xf32>
    %cst_3 = arith.constant dense<0.000000e+00> : vector<1x256xf32>
    %8 = vector.multi_reduction <add>, %7, %cst_3 [1] : vector<1x4x256xf32> to vector<1x256xf32>
    %9 = vector.shape_cast %8 : vector<1x256xf32> to vector<1x1x256xf32>
    %cst_4 = arith.constant 0.333333343 : f32
    %10 = vector.broadcast %cst_4 : f32 to vector<1x1x256xf32>
    %11 = arith.mulf %9, %10 : vector<1x1x256xf32>
    %cst_5 = arith.constant 9.99999974E-6 : f32
    %12 = vector.broadcast %cst_5 : f32 to vector<1x1x256xf32>
    %13 = arith.addf %11, %12 : vector<1x1x256xf32>
    %14 = math.sqrt %13 : vector<1x1x256xf32>
    %cst_6 = arith.constant 1.000000e+00 : f32
    %15 = vector.broadcast %cst_6 : f32 to vector<1x1x256xf32>
    %16 = arith.divf %15, %14 : vector<1x1x256xf32>
    %c0_7 = arith.constant 0 : index
    %c0_8 = arith.constant 0 : index
    %c0_9 = arith.constant 0 : index
    %17 = vector.load %arg3[%c0_7, %c0_8, %c0_9] : memref<1x1x256xf32, #tpu.memory_space<vmem>>, vector<1x1x256xf32>
    %c0_10 = arith.constant 0 : index
    %c0_11 = arith.constant 0 : index
    %c0_12 = arith.constant 0 : index
    %18 = vector.load %arg4[%c0_10, %c0_11, %c0_12] : memref<1x1x256xf32, #tpu.memory_space<vmem>>, vector<1x1x256xf32>
    %19 = arith.mulf %16, %17 : vector<1x1x256xf32>
    %20 = vector.broadcast %19 : vector<1x1x256xf32> to vector<1x4x256xf32>
    %21 = arith.mulf %6, %20 : vector<1x4x256xf32>
    %22 = vector.broadcast %18 : vector<1x1x256xf32> to vector<1x4x256xf32>
    %23 = arith.addf %21, %22 : vector<1x4x256xf32>
    %c0_13 = arith.constant 0 : index
    %c0_14 = arith.constant 0 : index
    %c0_15 = arith.constant 0 : index
    %24 = vector.load %arg5[%c0_13, %c0_14, %c0_15] : memref<1x4x256xf32, #tpu.memory_space<vmem>>, vector<1x4x256xf32>
    tpu.vector_store %arg5[%c0_13, %c0_14, %c0_15], %23 {strides = array<i32>} : memref<1x4x256xf32, #tpu.memory_space<vmem>>, vector<1x4x256xf32>,
    %c0_16 = arith.constant 0 : index
    %c0_17 = arith.constant 0 : index
    %c0_18 = arith.constant 0 : index
    %25 = vector.load %arg6[%c0_16, %c0_17, %c0_18] : memref<1x1x256xf32, #tpu.memory_space<vmem>>, vector<1x1x256xf32>
    tpu.vector_store %arg6[%c0_16, %c0_17, %c0_18], %4 {strides = array<i32>} : memref<1x1x256xf32, #tpu.memory_space<vmem>>, vector<1x1x256xf32>,
    %c0_19 = arith.constant 0 : index
    %c0_20 = arith.constant 0 : index
    %c0_21 = arith.constant 0 : index
    %26 = vector.load %arg7[%c0_19, %c0_20, %c0_21] : memref<1x1x256xf32, #tpu.memory_space<vmem>>, vector<1x1x256xf32>
    tpu.vector_store %arg7[%c0_19, %c0_20, %c0_21], %14 {strides = array<i32>} : memref<1x1x256xf32, #tpu.memory_space<vmem>>, vector<1x1x256xf32>,
    return
  }
  func.func @transform_0(%arg0: i32, %arg1: i32) -> (i32, i32, i32) {
    %c0_i32 = arith.constant 0 : i32
    %c0_i32_0 = arith.constant 0 : i32
    return %arg1, %c0_i32, %arg0 : i32, i32, i32
  }
  func.func @transform_1(%arg0: i32, %arg1: i32) -> (i32, i32, i32) {
    %c0_i32 = arith.constant 0 : i32
    %c0_i32_0 = arith.constant 0 : i32
    %c0_i32_1 = arith.constant 0 : i32
    return %c0_i32, %c0_i32_0, %arg0 : i32, i32, i32
  }
  func.func @transform_2(%arg0: i32, %arg1: i32) -> (i32, i32, i32) {
    %c0_i32 = arith.constant 0 : i32
    %c0_i32_0 = arith.constant 0 : i32
    %c0_i32_1 = arith.constant 0 : i32
    return %c0_i32, %c0_i32_0, %arg0 : i32, i32, i32
  }
  func.func @transform_3(%arg0: i32, %arg1: i32) -> (i32, i32, i32) {
    %c0_i32 = arith.constant 0 : i32
    %c0_i32_0 = arith.constant 0 : i32
    return %arg1, %c0_i32, %arg0 : i32, i32, i32
  }
  func.func @transform_4(%arg0: i32, %arg1: i32) -> (i32, i32, i32) {
    %c0_i32 = arith.constant 0 : i32
    %c0_i32_0 = arith.constant 0 : i32
    return %arg1, %c0_i32, %arg0 : i32, i32, i32
  }
  func.func @transform_5(%arg0: i32, %arg1: i32) -> (i32, i32, i32) {
    %c0_i32 = arith.constant 0 : i32
    %c0_i32_0 = arith.constant 0 : i32
    return %arg1, %c0_i32, %arg0 : i32, i32, i32
  }
}

</mosaic_0001>

<bundles_post_ra>
// kernel: tpu_custom_call.1
= control target key start
LH: loop header
LB: loop body
LE: loop exit
PB: predicated region body
PF: predicated region fallthrough
CT: control target
= control target key end

     0   :  { %11 = vsyncpa [#allocation3], 0  ;;  %s1313_s0 = inlined_call_operand.hbm [shape: f32[2,4,256], index: 0, kind: input, shape index: {}]   ;;  %s1314_s1 = inlined_call_operand.vmem [shape: f32[1,1,256], index: 1, kind: input, shape index: {}]   ;;  %s1315_s2 = inlined_call_operand.vmem [shape: f32[1,1,256], index: 2, kind: input, shape index: {}]   ;;  %s1316_s3 = inlined_call_operand.hbm [shape: f32[2,4,256], index: 3, kind: output, shape index: {0}]   ;;  %s1317_s4 = inlined_call_operand.hbm [shape: f32[2,1,256], index: 4, kind: output, shape index: {1}]   ;;  %s1318_s5 = inlined_call_operand.hbm [shape: f32[2,1,256], index: 5, kind: output, shape index: {2}]  }
   0x1   :  { %13 = vsyncpa [#allocation3 + $0x1], 0 }
   0x2   :  { %14 = vsyncpa [#allocation4], 0 }
   0x3   :  { %16 = vsyncpa [#allocation4 + $0x1], 0 }
   0x4   :  { %17 = vsyncpa [#allocation7], 0 }
   0x5   :  { %19 = vsyncpa [#allocation7 + $0x1], 0  ;;  %s1024_s18 = smov 0   ;;  %s1026_s19 = smov 0  }
   0x6   :  { %s1028_s20 = smov 0   ;;  %s1030_s21 = smov 0  }
   0x7   :  { %s1032_s22 = smov 0   ;;  %s1034_s23 = smov 0  }
   0x8 LB: > { %s1055_s24 = sadd.s32 4294967295, %s987_s23   ;;  %s1320_s25 = sadd.s32 4294967294, %s987_s23   ;;  %s987_s23 = sphi %s1034_s23, %s25_s23   ;;  %s983_s22 = sphi %s1032_s22, %s1338_s22   ;;  %s979_s21 = sphi %s1030_s21, %s1337_s21   ;;  %s975_s20 = sphi %s1028_s20, %s1336_s20   ;;  %s971_s19 = sphi %s1026_s19, %s1335_s19   ;;  %s967_s18 = sphi %s1024_s18, %s1334_s18  }
   0x9   : > { %s34_s26 = sadd.s32 1, %s983_s22  ;;  %s46_s27 = sadd.s32 1, %s975_s20 }
   0xa   : > { %p35_p0 = scmp.ge.s32.totalorder %s34_s26, 2  ;;  %p53_p1 = scmp.ne.s32.totalorder %s975_s20, %s971_s19 }
   0xb   : > { %p54_p2 = scmp.eq.s32.totalorder %s987_s23, 0  ;;  %p59_p3 = scmp.ne.s32.totalorder %s971_s19, %s967_s18 }
   0xc   : > { %s1340_s26 = smov (%p35_p0, %s34_s26), 0  ;;  %p60_p5 = scmp.eq.s32.totalorder %s1055_s24, 0 }
   0xd   : > { %p1067_p4 = por %p54_p2, %p53_p1  ;;  %s41_s29 = ssub.s32 %s983_s22, %s1340_s26 }
   0xe   : > { %p137_p6 = scmp.eq.s32.totalorder %s1055_s24, 1  ;;  %p44_p7 = scmp.eq.s32.totalorder %s41_s29, 0 }
   0xf   : > { %p1075_p8 = por %p60_p5, %p59_p3  ;;  %p143_p10 = scmp.eq.s32.totalorder %s1320_s25, 1 }
  0x10   : > { %p1079_p9 = por %p137_p6, %p53_p1  ;;  %p755_p13 = scmp.lt.s32.totalorder %s987_s23, 2 }
  0x11   : > { %s1086_s7 = scalar_select %p44_p7, %s975_s20, %s46_s27  }
  0x12   : > { %s1323_s6 = scalar_select %p1079_p9, 1, 0 }
  0x13   : > { %p1088_p11 = por %p143_p10, %p59_p3  ;;  %s235_s9 = sand.u32 1, %s975_s20  }
  0x14   : > { %s710_s10 = sshll.u32 %s235_s9, 3  ;;  %s729_s11 = sshll.u32 %s983_s22, 7 }
  0x15   : > { %s1324_s8 = scalar_select %p1088_p11, 1, 0 }
  0x16   : > { %s1099_s14 = scalar_lea.hbm %s1313_s0, %s729_s11  ;;  %s239_s15 = scalar_lea.vmem [#allocation2], %s710_s10 }
  0x17   : > { %s249_s16 = sshll.u32 %s239_s15, 4  ;;  %p1105_p0 = pnand %p755_p13, %p1067_p4  ;;  %s1101_s16 = int_to_ptr.vmem [resolvable:$true] %s249_s16 }
  0x18   : > { %s236_s27 = scalar_lea.sflag [#allocation3], %s235_s9  ;;  %s815_s29 = scalar_lea.hbm %s1099_s14, 128 }
  0x19   : > { %p816_p3 = scmp.ne.s32.totalorder %s1099_s14, %s815_s29  ;;  %p817_p5 = pneg %p1105_p0 }
  0x1a   : > { %s820_s28 = scalar_lea.hbm %s1313_s0, 256  ;;  %p821_p4 = scmp.lt.u32.totalorder %s1099_s14, %s1313_s0 }
  0x1b   : > { %p818_p6 = pnand %p817_p5, %p816_p3  ;;  %p822_p10 = scmp.lt.u32.totalorder %s820_s28, %s815_s29 }
  0x1c   : > { %p824_p12 = scmp.lt.u32.totalorder %s815_s29, %s1099_s14 }
  0x1d   : > { %p819_p7 = pneg %p818_p6  ;;  %p823_p13 = por %p822_p10, %p821_p4 }
  0x1f   : > { %p825_p1 = por %p824_p12, %p823_p13 }
  0x21   : > { %p826_p2 = pnand %p825_p1, %p819_p7 }
  0x23   : > { %829 = shalt.err (!%p826_p2)
}
  0x24   : > { %s830_s9 = scalar_lea.vmem %s1101_s16, 128  ;;  %s989_s15 = smov [#allocation2]  }
  0x25   : > { %p831_p3 = scmp.ne.s32.totalorder %s1101_s16, %s830_s9  ;;  %s835_s10 = sshll.u32 %s989_s15, 4  ;;  %s836_s10 = int_to_ptr.vmem [resolvable:$false] %s835_s10 }
  0x26   : > { %s837_s11 = scalar_lea.vmem %s836_s10, 256  ;;  %p838_p9 = scmp.lt.s32.totalorder %s1101_s16, %s836_s10 }
  0x27   : > { %p833_p6 = pnand %p831_p3, %p817_p5  ;;  %p839_p4 = scmp.lt.s32.totalorder %s837_s11, %s830_s9 }
  0x29   : > { %p834_p11 = pneg %p833_p6  ;;  %p840_p10 = por %p839_p4, %p838_p9 }
  0x2b   : > { %p841_p12 = pnand %p840_p10, %p834_p11 }
  0x2d   : > { %844 = shalt.err (!%p841_p12)
}
  0x2e   : > { %744 = dma.hbm_to_vmem [thread:$0]  (!%p1105_p0), %s1099_s14, 128, %s1101_s16, %s236_s27  }
  0x2f   : > { %p1326_p1 = scmp.lt.s32.totalorder %s987_s23, 3  ;;  %p1327_p2 = scmp.ge.s32.totalorder %s987_s23, 1 }
  0x31   : > { %p255_p5 = pnand %p1327_p2, %p1326_p1 }
  0x32   : > { %s1141_s29 = sand.u32 (!%p255_p5), 1, %s971_s19  }
  0x33   : > { %258 = sbr.rel (%p255_p5) target bundleno = 174 (0xae), region = 32  ;;  %s714_s28 = sshll.u32 (!%p255_p5), %s1141_s29, 3 }
  0x34   : > { %s261_s12 = scalar_lea.sflag (!%p255_p5), [#allocation3], %s1141_s29  ;;  %s264_s17 = scalar_lea.vmem (!%p255_p5), [#allocation2], %s714_s28 }
  0x3a   : > { %954 = dma.done.wait (%p1075_p8), %s261_s12, 128  }
  0x3b   : > { %956 = vsyncadd (%p1075_p8), %s261_s12, 4294967168  ;;  %vm327_vm0 = vcmask 1043456   ;;  %v323_v0 = vld [vmem:[%s264_s17] sm:$0xff]  ;;  %v990_v11 = vmov 1966171168   ;;  %v393_v15 = vlaneseq  ;;  %s716_s30 = sshll.u32 %s1141_s29, 1 }
  0x3c   : > { %v325_v1 = vcombine.high %v323_v0, %v323_v0  ;;  %v328_v2 = vsel %vm327_vm0, %v323_v0, 0.0  ;;  %v432_v12 = vunpack.c.l.s4 %v990_v11  ;;  %s301_s14 = scalar_lea.vmem [#allocation6], %s716_s30  ;;  %s475_s27 = sand.u32 1, %s1055_s24  }
  0x3d   : > { %v329_v3 = vrot.slane %v328_v2, 4  ;;  %v1154_v21 = vshrl.u32 %v393_v15, 7  ;;  %s513_s16 = sshll.u32 %s301_s14, 4  ;;  %s731_s13 = sshll.u32 %s979_s21, 5  ;;  %vm1166_vm1 = vcmp.lt.s32.totalorder %v393_v15, 256  ;;  %s1170_s16 = int_to_ptr.vmem [resolvable:$true] %s513_s16 }
  0x3e   : > { %v335_v4 = vsel %vm327_vm0, %v325_v1, 0.0  ;;  %v433_v18 = vunpack.c.0.s8 %v432_v12  ;;  %s1180_s15 = scalar_lea.hbm %s1317_s4, %s731_s13  ;;  %s1185_s10 = scalar_lea.sflag [#allocation7], %s475_s27 }
  0x3f   : > { %v330_v5 = vadd.f32 %v329_v3, %v328_v2  ;;  %v336_v6 = vrot.slane %v335_v4, 4  ;;  %s845_s11 = scalar_lea.vmem %s1170_s16, 32  ;;  %p1330_p9 = scmp.ne.s32.totalorder %s1323_s6, 0 }
  0x40   : > { %v1157_v23 = vsub.s32 %v433_v18, %v1154_v21  ;;  %p846_p8 = scmp.ne.s32.totalorder %s1170_s16, %s845_s11  ;;  %s991_s12 = smov [#allocation6]  }
  0x41   : > { %v331_v7 = vrot.slane %v330_v5, 2  ;;  %v337_v8 = vadd.f32 %v336_v6, %v335_v4  ;;  %s849_s17 = sshll.u32 %s991_s12, 4  ;;  %s850_s17 = int_to_ptr.vmem [resolvable:$false] %s849_s17 }
  0x42   : > { %p847_p11 = pnand %p846_p8, %p1330_p9  ;;  %s851_s24 = scalar_lea.vmem %s850_s17, 64 }
  0x43   : > { %v332_v9 = vadd.f32 %v331_v7, %v330_v5  ;;  %v338_v10 = vrot.slane %v337_v8, 2  ;;  %p852_p7 = scmp.lt.s32.totalorder %s1170_s16, %s850_s17  ;;  %p853_p13 = scmp.lt.s32.totalorder %s851_s24, %s845_s11 }
  0x44   : > { %p848_p0 = pneg %p847_p11 }
  0x45   : > { %v333_v13 = vrot.slane %v332_v9, 1  ;;  %v339_v14 = vadd.f32 %v338_v10, %v337_v8  ;;  %p854_p3 = por %p853_p13, %p852_p7 }
  0x47   : > { %v334_v16 = vadd.f32 %v333_v13, %v332_v9  ;;  %v340_v17 = vrot.slane %v339_v14, 1  ;;  %p855_p6 = pnand %p854_p3, %p848_p0 }
  0x49   : > { %v341_v19 = vadd.f32 %v340_v17, %v339_v14  ;;  %v343_v20 = vmul.f32 0.25, %v334_v16 }
  0x4b   : > { %v344_v22 = vmul.f32 0.25, %v341_v19 }
  0x4d   : > { %v347_v24 = vcombine.low %v343_v20, %v344_v22 }
  0x4f   : > { %v437_v25 = vrot.slane %v347_v24, %v1157_v23  ;;  %v1164_v26 = vsub.f32 %v323_v0, %v347_v24 }
  0x51   : > { %v444_v28 = vrot.slane %v437_v25, %v1157_v23  ;;  %v350_v29 = vmul.f32 %v1164_v26, %v1164_v26 }
  0x53   : > { %450 = vst.msk [vmem:[%s301_s14] sm:$0x3] %vm1166_vm1, %v444_v28  ;;  %v352_v30 = vcombine.high %v350_v29, %v350_v29  ;;  %v354_v31 = vsel %vm327_vm0, %v350_v29, 0.0 }
  0x54   : > { %v355_v32 = vrot.slane %v354_v31, 4 }
  0x55   : > { %858 = shalt.err (!%p855_p6)
}
  0x56   : > { %s859_s14 = scalar_lea.hbm %s1180_s15, 32  ;;  %s863_s12 = scalar_lea.hbm %s1317_s4, 64 }
  0x57   : > { %p860_p4 = scmp.ne.s32.totalorder %s1180_s15, %s859_s14  ;;  %p864_p1 = scmp.lt.u32.totalorder %s1180_s15, %s1317_s4 }
  0x58   : > { %p865_p2 = scmp.lt.u32.totalorder %s863_s12, %s859_s14  ;;  %p867_p8 = scmp.lt.u32.totalorder %s859_s14, %s1180_s15 }
  0x59   : > { %p861_p10 = pnand %p860_p4, %p1330_p9 }
  0x5a   : > { %p866_p5 = por %p865_p2, %p864_p1 }
  0x5b   : > { %p862_p12 = pneg %p861_p10 }
  0x5c   : > { %p868_p11 = por %p867_p8, %p866_p5 }
  0x5e   : > { %p869_p0 = pnand %p868_p11, %p862_p12 }
  0x60   : > { %872 = shalt.err (!%p869_p0)
}
  0x61   : > { %736 = dma.vmem_to_hbm [thread:$0]  (%p1330_p9), %s1170_s16, 32, %s1180_s15, %s1185_s10   ;;  %v361_v33 = vsel %vm327_vm0, %v352_v30, 0.0  ;;  %v356_v34 = vadd.f32 %v355_v32, %v354_v31  ;;  %v395_v60 = vsub.s32 0, %v1154_v21  ;;  %v390_v61 = vld [vmem:[%s1314_s1] sm:$0x3]  ;;  %v399_v63 = vsub.s32 1, %v1154_v21 }
  0x62   : > { %v362_v35 = vrot.slane %v361_v33, 4  ;;  %s308_s25 = scalar_lea.vmem [#allocation8], %s716_s30  ;;  %s1226_s30 = scalar_lea.hbm %s1318_s5, %s731_s13 }
  0x63   : > { %v357_v36 = vrot.slane %v356_v34, 2  ;;  %s529_s16 = sshll.u32 %s308_s25, 4  ;;  %v396_v1 = vrot.slane %v390_v61, %v395_v60  ;;  %v400_v2 = vrot.slane %v390_v61, %v399_v63  ;;  %s992_s9 = smov [#allocation8]   ;;  %s1219_s16 = int_to_ptr.vmem [resolvable:$true] %s529_s16 }
  0x64   : > { %v363_v37 = vadd.f32 %v362_v35, %v361_v33  ;;  %s873_s27 = scalar_lea.vmem %s1219_s16, 32  ;;  %s877_s12 = sshll.u32 %s992_s9, 4  ;;  %s878_s12 = int_to_ptr.vmem [resolvable:$false] %s877_s12 }
  0x65   : > { %v358_v38 = vadd.f32 %v357_v36, %v356_v34  ;;  %p874_p7 = scmp.ne.s32.totalorder %s1219_s16, %s873_s27  ;;  %s879_s17 = scalar_lea.vmem %s878_s12, 64 }
  0x66   : > { %v364_v39 = vrot.slane %v363_v37, 2  ;;  %p880_p6 = scmp.lt.s32.totalorder %s1219_s16, %s878_s12  ;;  %p881_p4 = scmp.lt.s32.totalorder %s879_s17, %s873_s27 }
  0x67   : > { %v359_v40 = vrot.slane %v358_v38, 1  ;;  %p875_p13 = pnand %p874_p7, %p1330_p9 }
  0x68   : > { %v365_v41 = vadd.f32 %v364_v39, %v363_v37  ;;  %p882_p10 = por %p881_p4, %p880_p6 }
  0x69   : > { %v360_v42 = vadd.f32 %v359_v40, %v358_v38  ;;  %p876_p3 = pneg %p875_p13 }
  0x6a   : > { %v366_v43 = vrot.slane %v365_v41, 1 }
  0x6b   : > { %v368_v45 = vmul.f32 0.33333334, %v360_v42  ;;  %p883_p12 = pnand %p882_p10, %p876_p3 }
  0x6c   : > { %v367_v44 = vadd.f32 %v366_v43, %v365_v41 }
  0x6d   : > { %v370_v47 = vadd.f32 1e-05, %v368_v45 }
  0x6e   : > { %v369_v46 = vmul.f32 0.33333334, %v367_v44 }
  0x6f   : > { %807 = vrsqrt.f32 %v370_v47  ;;  %vm374_vm2 = vcmp.eq.f32.partialorder %v370_v47, inf  ;;  %v377_v50 = vand.u32 2147483648, %v370_v47  ;;  %vm376_vm3 = vcmp.eq.f32.partialorder %v370_v47, 0.0 }
  0x70   : > { %v371_v48 = vadd.f32 1e-05, %v369_v46 }
  0x72   : > { %809 = vrsqrt.f32 %v371_v48  ;;  %vm381_vm4 = vcmp.eq.f32.partialorder %v371_v48, inf  ;;  %v384_v53 = vand.u32 2147483648, %v371_v48  ;;  %vm383_vm5 = vcmp.eq.f32.partialorder %v371_v48, 0.0 }
  0x79   : > { %v808_v49 = vpop.eup %807 }
  0x7a   : > { %v373_v51 = vmul.f32 %v808_v49, %v370_v47 }
  0x7c   : > { %v810_v52 = vpop.eup %809  ;;  %v375_v54 = vsel %vm374_vm2, %v370_v47, %v373_v51 }
  0x7d   : > { %v380_v55 = vmul.f32 %v810_v52, %v371_v48  ;;  %v378_v56 = vsel %vm376_vm3, %v377_v50, %v375_v54 }
  0x7e   : > { %811 = vrcp.f32 %v378_v56 }
  0x7f   : > { %v382_v57 = vsel %vm381_vm4, %v371_v48, %v380_v55 }
  0x80   : > { %v385_v58 = vsel %vm383_vm5, %v384_v53, %v382_v57 }
  0x81   : > { %813 = vrcp.f32 %v385_v58  ;;  %v453_v59 = vcombine.low %v378_v56, %v385_v58 }
  0x83   : > { %v460_v62 = vrot.slane %v453_v59, %v1157_v23 }
  0x85   : > { %v467_v0 = vrot.slane %v460_v62, %v1157_v23 }
  0x87   : > { %469 = vst.msk [vmem:[%s308_s25] sm:$0x3] %vm1166_vm1, %v467_v0 }
  0x88   : > { %886 = shalt.err (!%p883_p12)
}
  0x89   : > { %s887_s13 = scalar_lea.hbm %s1226_s30, 32  ;;  %s891_s11 = scalar_lea.hbm %s1318_s5, 64 }
  0x8a   : > { %p888_p1 = scmp.ne.s32.totalorder %s1226_s30, %s887_s13  ;;  %p892_p8 = scmp.lt.u32.totalorder %s1226_s30, %s1318_s5 }
  0x8b   : > { %p893_p11 = scmp.lt.u32.totalorder %s891_s11, %s887_s13  ;;  %p895_p7 = scmp.lt.u32.totalorder %s887_s13, %s1226_s30 }
  0x8c   : > { %p889_p2 = pnand %p888_p1, %p1330_p9 }
  0x8d   : > { %p894_p0 = por %p893_p11, %p892_p8 }
  0x8e   : > { %p890_p5 = pneg %p889_p2 }
  0x8f   : > { %p896_p13 = por %p895_p7, %p894_p0 }
  0x91   : > { %p897_p3 = pnand %p896_p13, %p890_p5 }
  0x93   : > { %900 = shalt.err (!%p897_p3)
}
  0x94   : > { %737 = dma.vmem_to_hbm [thread:$0]  (%p1330_p9), %s1219_s16, 32, %s1226_s30, %s1185_s10   ;;  %v812_v3 = vpop.eup %811  ;;  %v391_v4 = vld [vmem:[%s1315_s2] sm:$0x3] }
  0x95   : > { %v403_v5 = vmul.f32 %v812_v3, %v396_v1  ;;  %v814_v6 = vpop.eup %813  ;;  %v422_v9 = vrot.slane %v391_v4, %v395_v60  ;;  %v426_v10 = vrot.slane %v391_v4, %v399_v63  ;;  %s294_s12 = scalar_lea.vmem [#allocation5], %s714_s28  ;;  %s730_s10 = sshll.u32 %s979_s21, 7 }
  0x96   : > { %v404_v7 = vmul.f32 %v814_v6, %v400_v2  ;;  %s497_s17 = sshll.u32 %s294_s12, 4  ;;  %s1264_s13 = scalar_lea.hbm %s1316_s3, %s730_s10  ;;  %s1259_s17 = int_to_ptr.vmem [resolvable:$true] %s497_s17 }
  0x97   : > { %v408_v8 = vrot.slane %v403_v5, %v395_v60  ;;  %v427_v13 = vcombine.low %v422_v9, %v426_v10  ;;  %s471_s25 = scalar_lea.sflag [#allocation4], %s1141_s29  ;;  %s901_s15 = scalar_lea.vmem %s1259_s17, 128 }
  0x98   : > { %v412_v11 = vrot.slane %v404_v7, %v395_v60  ;;  %p902_p6 = scmp.ne.s32.totalorder %s1259_s17, %s901_s15  ;;  %s993_s21 = smov [#allocation5]  }
  0x99   : > { %s905_s28 = sshll.u32 %s993_s21, 4  ;;  %s906_s28 = int_to_ptr.vmem [resolvable:$false] %s905_s28 }
  0x9a   : > { %v415_v12 = vcombine.low %v408_v8, %v412_v11  ;;  %p903_p4 = pnand %p902_p6, %p1330_p9  ;;  %s907_s11 = scalar_lea.vmem %s906_s28, 256 }
  0x9b   : > { %p908_p12 = scmp.lt.s32.totalorder %s1259_s17, %s906_s28  ;;  %p909_p1 = scmp.lt.s32.totalorder %s907_s11, %s901_s15 }
  0x9c   : > { %v417_v14 = vmul.f32 %v415_v12, %v1164_v26  ;;  %p904_p10 = pneg %p903_p4 }
  0x9d   : > { %p910_p2 = por %p909_p1, %p908_p12 }
  0x9e   : > { %v429_v15 = vadd.f32 %v427_v13, %v417_v14 }
  0x9f   : > { %p911_p5 = pnand %p910_p2, %p904_p10 }
  0xa0   : > { %430 = vst [vmem:[%s294_s12] sm:$0xff] %v429_v15 }
  0xa1   : > { %914 = shalt.err (!%p911_p5)
}
  0xa2   : > { %s915_s29 = scalar_lea.hbm %s1264_s13, 128  ;;  %s919_s27 = scalar_lea.hbm %s1316_s3, 256 }
  0xa3   : > { %p916_p8 = scmp.ne.s32.totalorder %s1264_s13, %s915_s29  ;;  %p920_p7 = scmp.lt.u32.totalorder %s1264_s13, %s1316_s3 }
  0xa4   : > { %p921_p13 = scmp.lt.u32.totalorder %s919_s27, %s915_s29  ;;  %p923_p6 = scmp.lt.u32.totalorder %s915_s29, %s1264_s13 }
  0xa5   : > { %p917_p11 = pnand %p916_p8, %p1330_p9 }
  0xa6   : > { %p922_p3 = por %p921_p13, %p920_p7 }
  0xa7   : > { %p918_p0 = pneg %p917_p11 }
  0xa8   : > { %p924_p4 = por %p923_p6, %p922_p3 }
  0xaa   : > { %p925_p10 = pnand %p924_p4, %p918_p0 }
  0xac   : > { %928 = shalt.err (!%p925_p10)
}
  0xad   : > { %735 = dma.vmem_to_hbm [thread:$0]  (%p1330_p9), %s1259_s17, 128, %s1264_s13, %s471_s25  }
  0xae PF: > { %s541_s10 = sand.u32 1, %s967_s18   ;;  %p1331_p12 = scmp.ne.s32.totalorder %s1324_s8, 0 }
  0xaf   : > { %p1332_p1 = scmp.ge.s32.totalorder %s987_s23, 2  ;;  %s542_s16 = scalar_lea.sflag [#allocation4], %s541_s10 }
  0xb1   : > { %p746_p2 = pnand %p1332_p1, %p1331_p12 }
  0xb3   : > { %958 = dma.done.wait (!%p746_p2), %s542_s16, 128  }
  0xb4   : > { %960 = vsyncadd (!%p746_p2), %s542_s16, 4294967168  ;;  %s1333_s30 = sadd.s32 4294967294, %s987_s23  }
  0xb5   : > { %s550_s15 = sand.u32 1, %s1333_s30  }
  0xb6   : > { %s551_s21 = scalar_lea.sflag [#allocation7], %s550_s15 }
  0xb7   : > { %962 = dma.done.wait (!%p746_p2), %s551_s21, 64  }
  0xb8   : > { %964 = vsyncadd (!%p746_p2), %s551_s21, 4294967232  ;;  %s25_s23 = sadd.s32 1, %s987_s23   ;;  %s1334_s18 = smov %s971_s19 }
  0xb9   : > { %p22_p9 = scmp.ge.s32.totalorder %s25_s23, 4   ;;  %s1335_s19 = smov %s975_s20 }
  0xba   : > { %s1336_s20 = smov %s1086_s7  ;;  %s1337_s21 = smov %s983_s22 }
  0xbb   : > { %s1338_s22 = smov %s1340_s26  ;;  %24 = sbr.rel (!%p22_p9) target bundleno = 8 (0x8), region = 115 }
  0xc2   :  { %565 = vsyncpa [#allocation3], 1 }
  0xc3   :  { %567 = vsyncpa [#allocation3 + $0x1], 1 }
  0xc4   :  { %568 = vsyncpa [#allocation4], 1 }
  0xc5   :  { %570 = vsyncpa [#allocation4 + $0x1], 1 }
  0xc6   :  { %571 = vsyncpa [#allocation7], 1 }
  0xc7   :  { %573 = vsyncpa [#allocation7 + $0x1], 1 }

</bundles_post_ra>
